<compile_context>
chip_gen: v6e
topology: v6e:2x2x1
jax: 0.10.0
libtpu: 0.0.40
codegen_flags: <defaults>
</compile_context>

<pallas_src>
import functools
import math

import jax
import jax.numpy as jnp
from jax.experimental import pallas as pl
from jax.experimental.pallas import tpu as pltpu


def mha_tanh_kernel(q_ref, k_ref, v_ref,
                    wq_ref, bq_ref, wk_ref, bk_ref, wv_ref, bv_ref,
                    wo_ref, bo_ref, o_ref, *, heads, d_k, scale):
    # q/k/v_ref: (1, seq, d_model); weights: (d_model, d_model); bias: (1, d_model)
    q2d = q_ref[0]                       # (seq, d_model)
    k2d = k_ref[0]
    v2d = v_ref[0]
    in_dtype = q_ref.dtype

    # Full-width QKV projections (best MXU column utilization), f32 accumulate.
    qp = jnp.dot(q2d, wq_ref[...], preferred_element_type=jnp.float32) + bq_ref[...]
    kp = jnp.dot(k2d, wk_ref[...], preferred_element_type=jnp.float32) + bk_ref[...]
    vp = jnp.dot(v2d, wv_ref[...], preferred_element_type=jnp.float32) + bv_ref[...]

    seq = q2d.shape[0]
    d_model = wo_ref.shape[1]
    acc = jnp.zeros((seq, d_model), jnp.float32)

    # Static (unrolled) per-head loop; no softmax so each head is independent
    # elementwise tanh + two small matmuls, accumulated through the out-proj slice.
    for h in range(heads):
        lo = h * d_k
        qh = qp[:, lo:lo + d_k].astype(in_dtype)        # (seq, d_k)
        kh = kp[:, lo:lo + d_k].astype(in_dtype)
        vh = vp[:, lo:lo + d_k].astype(in_dtype)

        # scores = Q_h K_h^T / sqrt(d_k), then tanh (EUP).
        s = jax.lax.dot_general(qh, kh, (((1,), (1,)), ((), ())),
                                preferred_element_type=jnp.float32) * scale
        s = jnp.tanh(s)
        # TODO(synk): attention mask (masked_fill to 0) and score-dropout omitted
        # (forward implemented for mask=None, eval mode).

        oh = jnp.dot(s.astype(in_dtype), vh,
                     preferred_element_type=jnp.float32)            # (seq, d_k)
        # Distributed output projection: concat_h(O_h) @ Wo == sum_h O_h @ Wo[h-slice]
        acc = acc + jnp.dot(oh.astype(in_dtype), wo_ref[lo:lo + d_k, :],
                            preferred_element_type=jnp.float32)

    o_ref[0] = (acc + bo_ref[...]).astype(o_ref.dtype)


def multi_head_attention_tanh(q, k, v, wq, bq, wk, bk, wv, bv, wo, bo, *, heads):
    """q, k, v: (batch, seq, d_model) -> (batch, seq, d_model).

    Weights are stored transposed (in_features, out_features); biases are (1, out).
    """
    bs, seq, d_model = q.shape
    assert d_model % heads == 0
    d_k = d_model // heads
    scale = 1.0 / math.sqrt(d_k)
    itemsize = jnp.dtype(q.dtype).itemsize

    kernel = functools.partial(mha_tanh_kernel, heads=heads, d_k=d_k, scale=scale)

    io_spec = pl.BlockSpec((1, seq, d_model), lambda b: (b, 0, 0))
    w_spec = pl.BlockSpec((d_model, d_model), lambda b: (0, 0))   # resident weights
    b_spec = pl.BlockSpec((1, d_model), lambda b: (0, 0))         # resident biases

    # Explicit VMEM budget: resident weights + double-buffered in/out tiles +
    # in-kernel f32 intermediates, with 2x headroom, clamped to a limit that is
    # safe on every generation (v7x physical VMEM is 64 MiB / TC).
    weights_bytes = 4 * d_model * d_model * itemsize + 4 * d_model * itemsize
    tile_bytes = seq * d_model * itemsize
    interm_bytes = (4 * seq * d_model + seq * seq) * 4              # qp/kp/vp/acc + scores
    vmem_needed = weights_bytes + (3 + 1) * 2 * tile_bytes + interm_bytes
    vmem_limit = int(min(max(2 * vmem_needed, 16 * 1024 * 1024), 48 * 1024 * 1024))

    cost = pl.CostEstimate(
        flops=bs * (8 * seq * d_model * d_model + 4 * seq * seq * d_model),
        transcendentals=bs * heads * seq * seq,
        bytes_accessed=(4 * bs * seq * d_model + 4 * d_model * d_model
                        + 4 * d_model) * itemsize,
    )

    return pl.pallas_call(
        kernel,
        out_shape=jax.ShapeDtypeStruct((bs, seq, d_model), q.dtype),
        grid_spec=pltpu.PrefetchScalarGridSpec(
            num_scalar_prefetch=0,
            grid=(bs,),
            in_specs=[io_spec, io_spec, io_spec,
                      w_spec, b_spec,    # Wq, bq
                      w_spec, b_spec,    # Wk, bk
                      w_spec, b_spec,    # Wv, bv
                      w_spec, b_spec],   # Wo, bo
            out_specs=io_spec,
        ),
        compiler_params=pltpu.CompilerParams(
            dimension_semantics=("parallel",),   # batch rows independent -> megacore
            vmem_limit_bytes=vmem_limit,
        ),
        cost_estimate=cost,
    )(q, k, v, wq, bq, wk, bk, wv, bv, wo, bo)


def _init_linear(key, fan_in, fan_out, dtype=jnp.float32):
    """torch.nn.Linear default init: U(-1/sqrt(fan_in), 1/sqrt(fan_in)).
    Returns (W_transposed (fan_in, fan_out), b (1, fan_out))."""
    kw, kb = jax.random.split(key)
    bound = 1.0 / math.sqrt(fan_in)
    w_t = jax.random.uniform(kw, (fan_in, fan_out), dtype, -bound, bound)
    b = jax.random.uniform(kb, (1, fan_out), dtype, -bound, bound)
    return w_t, b


def _reference(q, k, v, wq, bq, wk, bk, wv, bv, wo, bo, heads):
    """Pure-JAX mirror of the PyTorch forward (mask=None, eval mode)."""
    bs, seq, d_model = q.shape
    d_k = d_model // heads
    def proj(x, w, b):
        return (x @ w + b[0]).reshape(bs, seq, heads, d_k).transpose(0, 2, 1, 3)
    Q, K, V = proj(q, wq, bq), proj(k, wk, bk), proj(v, wv, bv)
    s = jnp.tanh(jnp.einsum('bhqd,bhkd->bhqk', Q, K) / math.sqrt(d_k))
    o = jnp.einsum('bhqk,bhkd->bhqd', s, V)
    concat = o.transpose(0, 2, 1, 3).reshape(bs, seq, d_model)
    return concat @ wo + bo[0]


if __name__ == "__main__":
    # Small but lane-aligned demo shapes: d_model multiple of 128, seq multiple of 8.
    batch, seq, d_model, heads = 2, 16, 128, 4

    key = jax.random.PRNGKey(0)
    kq, kk, kv, k1, k2, k3, k4 = jax.random.split(key, 7)

    q = jax.random.normal(kq, (batch, seq, d_model), jnp.float32)
    k = jax.random.normal(kk, (batch, seq, d_model), jnp.float32)
    v = jax.random.normal(kv, (batch, seq, d_model), jnp.float32)

    wq, bq = _init_linear(k1, d_model, d_model)
    wk, bk = _init_linear(k2, d_model, d_model)
    wv, bv = _init_linear(k3, d_model, d_model)
    wo, bo = _init_linear(k4, d_model, d_model)

    out = multi_head_attention_tanh(q, k, v, wq, bq, wk, bk, wv, bv, wo, bo,
                                    heads=heads)
    out = jax.block_until_ready(out)

    ref = _reference(q, k, v, wq, bq, wk, bk, wv, bv, wo, bo, heads)
    assert out.shape == (batch, seq, d_model)
    assert jnp.allclose(out, ref, atol=1e-4, rtol=1e-4), "mismatch vs reference"

    print("KERNEL_OK")
</pallas_src>

<mosaic_0001>
module attributes {stable_mosaic.version = 11 : i64} {
  func.func @mha_tanh_kernel(%arg0: i32, %arg1: memref<1x16x128xf32, #tpu.memory_space<vmem>>, %arg2: memref<1x16x128xf32, #tpu.memory_space<vmem>>, %arg3: memref<1x16x128xf32, #tpu.memory_space<vmem>>, %arg4: memref<128x128xf32, #tpu.memory_space<vmem>>, %arg5: memref<1x128xf32, #tpu.memory_space<vmem>>, %arg6: memref<128x128xf32, #tpu.memory_space<vmem>>, %arg7: memref<1x128xf32, #tpu.memory_space<vmem>>, %arg8: memref<128x128xf32, #tpu.memory_space<vmem>>, %arg9: memref<1x128xf32, #tpu.memory_space<vmem>>, %arg10: memref<128x128xf32, #tpu.memory_space<vmem>>, %arg11: memref<1x128xf32, #tpu.memory_space<vmem>>, %arg12: memref<1x16x128xf32, #tpu.memory_space<vmem>>) attributes {dimension_semantics = [#tpu.dimension_semantics<parallel>], iteration_bounds = array<i64: 2>, scalar_prefetch = 0 : i64, scratch_operands = 0 : i64, tpu.core_type = #tpu.core_type<tc>, window_params = [{transform_indices = @transform_0, window_bounds = array<i64: 1, 16, 128>}, {transform_indices = @transform_1, window_bounds = array<i64: 1, 16, 128>}, {transform_indices = @transform_2, window_bounds = array<i64: 1, 16, 128>}, {pipeline_mode = #tpu.pipeline_mode<synchronous>, transform_indices = @transform_3, window_bounds = array<i64: 128, 128>}, {pipeline_mode = #tpu.pipeline_mode<synchronous>, transform_indices = @transform_4, window_bounds = array<i64: 1, 128>}, {pipeline_mode = #tpu.pipeline_mode<synchronous>, transform_indices = @transform_5, window_bounds = array<i64: 128, 128>}, {pipeline_mode = #tpu.pipeline_mode<synchronous>, transform_indices = @transform_6, window_bounds = array<i64: 1, 128>}, {pipeline_mode = #tpu.pipeline_mode<synchronous>, transform_indices = @transform_7, window_bounds = array<i64: 128, 128>}, {pipeline_mode = #tpu.pipeline_mode<synchronous>, transform_indices = @transform_8, window_bounds = array<i64: 1, 128>}, {pipeline_mode = #tpu.pipeline_mode<synchronous>, transform_indices = @transform_9, window_bounds = array<i64: 128, 128>}, {pipeline_mode = #tpu.pipeline_mode<synchronous>, transform_indices = @transform_10, window_bounds = array<i64: 1, 128>}, {transform_indices = @transform_11, window_bounds = array<i64: 1, 16, 128>}]} {
    %c0 = arith.constant 0 : index
    %c0_0 = arith.constant 0 : index
    %c0_1 = arith.constant 0 : index
    %0 = vector.load %arg1[%c0, %c0_0, %c0_1] : memref<1x16x128xf32, #tpu.memory_space<vmem>>, vector<1x16x128xf32>
    %1 = vector.shape_cast %0 : vector<1x16x128xf32> to vector<16x128xf32>
    %c0_2 = arith.constant 0 : index
    %c0_3 = arith.constant 0 : index
    %c0_4 = arith.constant 0 : index
    %2 = vector.load %arg2[%c0_2, %c0_3, %c0_4] : memref<1x16x128xf32, #tpu.memory_space<vmem>>, vector<1x16x128xf32>
    %3 = vector.shape_cast %2 : vector<1x16x128xf32> to vector<16x128xf32>
    %c0_5 = arith.constant 0 : index
    %c0_6 = arith.constant 0 : index
    %c0_7 = arith.constant 0 : index
    %4 = vector.load %arg3[%c0_5, %c0_6, %c0_7] : memref<1x16x128xf32, #tpu.memory_space<vmem>>, vector<1x16x128xf32>
    %5 = vector.shape_cast %4 : vector<1x16x128xf32> to vector<16x128xf32>
    %c0_8 = arith.constant 0 : index
    %c0_9 = arith.constant 0 : index
    %6 = vector.load %arg4[%c0_8, %c0_9] : memref<128x128xf32, #tpu.memory_space<vmem>>, vector<128x128xf32>
    %cst = arith.constant dense<0.000000e+00> : vector<16x128xf32>
    %7 = tpu.matmul %1, %6, %cst {dimension_numbers = #tpu.dot_dimension_numbers<[1], [0], [0], [1], [0, 0, 1, 1], [], []>} : vector<16x128xf32>, vector<128x128xf32>, vector<16x128xf32> -> vector<16x128xf32>
    %c0_10 = arith.constant 0 : index
    %c0_11 = arith.constant 0 : index
    %8 = vector.load %arg5[%c0_10, %c0_11] : memref<1x128xf32, #tpu.memory_space<vmem>>, vector<1x128xf32>
    %9 = vector.broadcast %8 : vector<1x128xf32> to vector<16x128xf32>
    %10 = arith.addf %7, %9 : vector<16x128xf32>
    %c0_12 = arith.constant 0 : index
    %c0_13 = arith.constant 0 : index
    %11 = vector.load %arg6[%c0_12, %c0_13] : memref<128x128xf32, #tpu.memory_space<vmem>>, vector<128x128xf32>
    %cst_14 = arith.constant dense<0.000000e+00> : vector<16x128xf32>
    %12 = tpu.matmul %3, %11, %cst_14 {dimension_numbers = #tpu.dot_dimension_numbers<[1], [0], [0], [1], [0, 0, 1, 1], [], []>} : vector<16x128xf32>, vector<128x128xf32>, vector<16x128xf32> -> vector<16x128xf32>
    %c0_15 = arith.constant 0 : index
    %c0_16 = arith.constant 0 : index
    %13 = vector.load %arg7[%c0_15, %c0_16] : memref<1x128xf32, #tpu.memory_space<vmem>>, vector<1x128xf32>
    %14 = vector.broadcast %13 : vector<1x128xf32> to vector<16x128xf32>
    %15 = arith.addf %12, %14 : vector<16x128xf32>
    %c0_17 = arith.constant 0 : index
    %c0_18 = arith.constant 0 : index
    %16 = vector.load %arg8[%c0_17, %c0_18] : memref<128x128xf32, #tpu.memory_space<vmem>>, vector<128x128xf32>
    %cst_19 = arith.constant dense<0.000000e+00> : vector<16x128xf32>
    %17 = tpu.matmul %5, %16, %cst_19 {dimension_numbers = #tpu.dot_dimension_numbers<[1], [0], [0], [1], [0, 0, 1, 1], [], []>} : vector<16x128xf32>, vector<128x128xf32>, vector<16x128xf32> -> vector<16x128xf32>
    %c0_20 = arith.constant 0 : index
    %c0_21 = arith.constant 0 : index
    %18 = vector.load %arg9[%c0_20, %c0_21] : memref<1x128xf32, #tpu.memory_space<vmem>>, vector<1x128xf32>
    %19 = vector.broadcast %18 : vector<1x128xf32> to vector<16x128xf32>
    %20 = arith.addf %17, %19 : vector<16x128xf32>
    %cst_22 = arith.constant 0.000000e+00 : f32
    %21 = vector.broadcast %cst_22 : f32 to vector<16x128xf32>
    %22 = vector.extract_strided_slice %10 {offsets = [0, 0], sizes = [16, 32], strides = [1, 1]} : vector<16x128xf32> to vector<16x32xf32>
    %23 = vector.extract_strided_slice %15 {offsets = [0, 0], sizes = [16, 32], strides = [1, 1]} : vector<16x128xf32> to vector<16x32xf32>
    %24 = vector.extract_strided_slice %20 {offsets = [0, 0], sizes = [16, 32], strides = [1, 1]} : vector<16x128xf32> to vector<16x32xf32>
    %cst_23 = arith.constant dense<0.000000e+00> : vector<16x16xf32>
    %25 = tpu.matmul %22, %23, %cst_23 {dimension_numbers = #tpu.dot_dimension_numbers<[1], [1], [0], [0], [0, 0, 1, 0], [], []>} : vector<16x32xf32>, vector<16x32xf32>, vector<16x16xf32> -> vector<16x16xf32>
    %cst_24 = arith.constant 0.176776692 : f32
    %26 = vector.broadcast %cst_24 : f32 to vector<16x16xf32>
    %27 = arith.mulf %25, %26 : vector<16x16xf32>
    %28 = math.tanh %27 : vector<16x16xf32>
    %cst_25 = arith.constant dense<0.000000e+00> : vector<16x32xf32>
    %29 = tpu.matmul %28, %24, %cst_25 {dimension_numbers = #tpu.dot_dimension_numbers<[1], [0], [0], [1], [0, 0, 1, 1], [], []>} : vector<16x16xf32>, vector<16x32xf32>, vector<16x32xf32> -> vector<16x32xf32>
    %c0_26 = arith.constant 0 : index
    %c0_27 = arith.constant 0 : index
    %30 = vector.load %arg10[%c0_26, %c0_27] : memref<128x128xf32, #tpu.memory_space<vmem>>, vector<32x128xf32>
    %cst_28 = arith.constant dense<0.000000e+00> : vector<16x128xf32>
    %31 = tpu.matmul %29, %30, %cst_28 {dimension_numbers = #tpu.dot_dimension_numbers<[1], [0], [0], [1], [0, 0, 1, 1], [], []>} : vector<16x32xf32>, vector<32x128xf32>, vector<16x128xf32> -> vector<16x128xf32>
    %32 = arith.addf %21, %31 : vector<16x128xf32>
    %33 = vector.extract_strided_slice %10 {offsets = [0, 32], sizes = [16, 32], strides = [1, 1]} : vector<16x128xf32> to vector<16x32xf32>
    %34 = vector.extract_strided_slice %15 {offsets = [0, 32], sizes = [16, 32], strides = [1, 1]} : vector<16x128xf32> to vector<16x32xf32>
    %35 = vector.extract_strided_slice %20 {offsets = [0, 32], sizes = [16, 32], strides = [1, 1]} : vector<16x128xf32> to vector<16x32xf32>
    %cst_29 = arith.constant dense<0.000000e+00> : vector<16x16xf32>
    %36 = tpu.matmul %33, %34, %cst_29 {dimension_numbers = #tpu.dot_dimension_numbers<[1], [1], [0], [0], [0, 0, 1, 0], [], []>} : vector<16x32xf32>, vector<16x32xf32>, vector<16x16xf32> -> vector<16x16xf32>
    %cst_30 = arith.constant 0.176776692 : f32
    %37 = vector.broadcast %cst_30 : f32 to vector<16x16xf32>
    %38 = arith.mulf %36, %37 : vector<16x16xf32>
    %39 = math.tanh %38 : vector<16x16xf32>
    %cst_31 = arith.constant dense<0.000000e+00> : vector<16x32xf32>
    %40 = tpu.matmul %39, %35, %cst_31 {dimension_numbers = #tpu.dot_dimension_numbers<[1], [0], [0], [1], [0, 0, 1, 1], [], []>} : vector<16x16xf32>, vector<16x32xf32>, vector<16x32xf32> -> vector<16x32xf32>
    %c32 = arith.constant 32 : index
    %c0_32 = arith.constant 0 : index
    %41 = vector.load %arg10[%c32, %c0_32] : memref<128x128xf32, #tpu.memory_space<vmem>>, vector<32x128xf32>
    %cst_33 = arith.constant dense<0.000000e+00> : vector<16x128xf32>
    %42 = tpu.matmul %40, %41, %cst_33 {dimension_numbers = #tpu.dot_dimension_numbers<[1], [0], [0], [1], [0, 0, 1, 1], [], []>} : vector<16x32xf32>, vector<32x128xf32>, vector<16x128xf32> -> vector<16x128xf32>
    %43 = arith.addf %32, %42 : vector<16x128xf32>
    %44 = vector.extract_strided_slice %10 {offsets = [0, 64], sizes = [16, 32], strides = [1, 1]} : vector<16x128xf32> to vector<16x32xf32>
    %45 = vector.extract_strided_slice %15 {offsets = [0, 64], sizes = [16, 32], strides = [1, 1]} : vector<16x128xf32> to vector<16x32xf32>
    %46 = vector.extract_strided_slice %20 {offsets = [0, 64], sizes = [16, 32], strides = [1, 1]} : vector<16x128xf32> to vector<16x32xf32>
    %cst_34 = arith.constant dense<0.000000e+00> : vector<16x16xf32>
    %47 = tpu.matmul %44, %45, %cst_34 {dimension_numbers = #tpu.dot_dimension_numbers<[1], [1], [0], [0], [0, 0, 1, 0], [], []>} : vector<16x32xf32>, vector<16x32xf32>, vector<16x16xf32> -> vector<16x16xf32>
    %cst_35 = arith.constant 0.176776692 : f32
    %48 = vector.broadcast %cst_35 : f32 to vector<16x16xf32>
    %49 = arith.mulf %47, %48 : vector<16x16xf32>
    %50 = math.tanh %49 : vector<16x16xf32>
    %cst_36 = arith.constant dense<0.000000e+00> : vector<16x32xf32>
    %51 = tpu.matmul %50, %46, %cst_36 {dimension_numbers = #tpu.dot_dimension_numbers<[1], [0], [0], [1], [0, 0, 1, 1], [], []>} : vector<16x16xf32>, vector<16x32xf32>, vector<16x32xf32> -> vector<16x32xf32>
    %c64 = arith.constant 64 : index
    %c0_37 = arith.constant 0 : index
    %52 = vector.load %arg10[%c64, %c0_37] : memref<128x128xf32, #tpu.memory_space<vmem>>, vector<32x128xf32>
    %cst_38 = arith.constant dense<0.000000e+00> : vector<16x128xf32>
    %53 = tpu.matmul %51, %52, %cst_38 {dimension_numbers = #tpu.dot_dimension_numbers<[1], [0], [0], [1], [0, 0, 1, 1], [], []>} : vector<16x32xf32>, vector<32x128xf32>, vector<16x128xf32> -> vector<16x128xf32>
    %54 = arith.addf %43, %53 : vector<16x128xf32>
    %55 = vector.extract_strided_slice %10 {offsets = [0, 96], sizes = [16, 32], strides = [1, 1]} : vector<16x128xf32> to vector<16x32xf32>
    %56 = vector.extract_strided_slice %15 {offsets = [0, 96], sizes = [16, 32], strides = [1, 1]} : vector<16x128xf32> to vector<16x32xf32>
    %57 = vector.extract_strided_slice %20 {offsets = [0, 96], sizes = [16, 32], strides = [1, 1]} : vector<16x128xf32> to vector<16x32xf32>
    %cst_39 = arith.constant dense<0.000000e+00> : vector<16x16xf32>
    %58 = tpu.matmul %55, %56, %cst_39 {dimension_numbers = #tpu.dot_dimension_numbers<[1], [1], [0], [0], [0, 0, 1, 0], [], []>} : vector<16x32xf32>, vector<16x32xf32>, vector<16x16xf32> -> vector<16x16xf32>
    %cst_40 = arith.constant 0.176776692 : f32
    %59 = vector.broadcast %cst_40 : f32 to vector<16x16xf32>
    %60 = arith.mulf %58, %59 : vector<16x16xf32>
    %61 = math.tanh %60 : vector<16x16xf32>
    %cst_41 = arith.constant dense<0.000000e+00> : vector<16x32xf32>
    %62 = tpu.matmul %61, %57, %cst_41 {dimension_numbers = #tpu.dot_dimension_numbers<[1], [0], [0], [1], [0, 0, 1, 1], [], []>} : vector<16x16xf32>, vector<16x32xf32>, vector<16x32xf32> -> vector<16x32xf32>
    %c96 = arith.constant 96 : index
    %c0_42 = arith.constant 0 : index
    %63 = vector.load %arg10[%c96, %c0_42] : memref<128x128xf32, #tpu.memory_space<vmem>>, vector<32x128xf32>
    %cst_43 = arith.constant dense<0.000000e+00> : vector<16x128xf32>
    %64 = tpu.matmul %62, %63, %cst_43 {dimension_numbers = #tpu.dot_dimension_numbers<[1], [0], [0], [1], [0, 0, 1, 1], [], []>} : vector<16x32xf32>, vector<32x128xf32>, vector<16x128xf32> -> vector<16x128xf32>
    %65 = arith.addf %54, %64 : vector<16x128xf32>
    %c0_44 = arith.constant 0 : index
    %c0_45 = arith.constant 0 : index
    %66 = vector.load %arg11[%c0_44, %c0_45] : memref<1x128xf32, #tpu.memory_space<vmem>>, vector<1x128xf32>
    %67 = vector.broadcast %66 : vector<1x128xf32> to vector<16x128xf32>
    %68 = arith.addf %65, %67 : vector<16x128xf32>
    %c0_46 = arith.constant 0 : index
    %c0_47 = arith.constant 0 : index
    %c0_48 = arith.constant 0 : index
    %69 = vector.load %arg12[%c0_46, %c0_47, %c0_48] : memref<1x16x128xf32, #tpu.memory_space<vmem>>, vector<1x16x128xf32>
    %70 = vector.shape_cast %69 : vector<1x16x128xf32> to vector<16x128xf32>
    %71 = vector.shape_cast %68 : vector<16x128xf32> to vector<1x16x128xf32>
    tpu.vector_store %arg12[%c0_46, %c0_47, %c0_48], %71 {strides = array<i32>} : memref<1x16x128xf32, #tpu.memory_space<vmem>>, vector<1x16x128xf32>,
    return
  }
  func.func @transform_0(%arg0: i32) -> (i32, i32, i32) {
    %c0_i32 = arith.constant 0 : i32
    %c0_i32_0 = arith.constant 0 : i32
    %c0_i32_1 = arith.constant 0 : i32
    return %arg0, %c0_i32, %c0_i32_0 : i32, i32, i32
  }
  func.func @transform_1(%arg0: i32) -> (i32, i32, i32) {
    %c0_i32 = arith.constant 0 : i32
    %c0_i32_0 = arith.constant 0 : i32
    %c0_i32_1 = arith.constant 0 : i32
    return %arg0, %c0_i32, %c0_i32_0 : i32, i32, i32
  }
  func.func @transform_2(%arg0: i32) -> (i32, i32, i32) {
    %c0_i32 = arith.constant 0 : i32
    %c0_i32_0 = arith.constant 0 : i32
    %c0_i32_1 = arith.constant 0 : i32
    return %arg0, %c0_i32, %c0_i32_0 : i32, i32, i32
  }
  func.func @transform_3(%arg0: i32) -> (i32, i32) {
    %c0_i32 = arith.constant 0 : i32
    %c0_i32_0 = arith.constant 0 : i32
    %c0_i32_1 = arith.constant 0 : i32
    return %c0_i32, %c0_i32_0 : i32, i32
  }
  func.func @transform_4(%arg0: i32) -> (i32, i32) {
    %c0_i32 = arith.constant 0 : i32
    %c0_i32_0 = arith.constant 0 : i32
    %c0_i32_1 = arith.constant 0 : i32
    return %c0_i32, %c0_i32_0 : i32, i32
  }
  func.func @transform_5(%arg0: i32) -> (i32, i32) {
    %c0_i32 = arith.constant 0 : i32
    %c0_i32_0 = arith.constant 0 : i32
    %c0_i32_1 = arith.constant 0 : i32
    return %c0_i32, %c0_i32_0 : i32, i32
  }
  func.func @transform_6(%arg0: i32) -> (i32, i32) {
    %c0_i32 = arith.constant 0 : i32
    %c0_i32_0 = arith.constant 0 : i32
    %c0_i32_1 = arith.constant 0 : i32
    return %c0_i32, %c0_i32_0 : i32, i32
  }
  func.func @transform_7(%arg0: i32) -> (i32, i32) {
    %c0_i32 = arith.constant 0 : i32
    %c0_i32_0 = arith.constant 0 : i32
    %c0_i32_1 = arith.constant 0 : i32
    return %c0_i32, %c0_i32_0 : i32, i32
  }
  func.func @transform_8(%arg0: i32) -> (i32, i32) {
    %c0_i32 = arith.constant 0 : i32
    %c0_i32_0 = arith.constant 0 : i32
    %c0_i32_1 = arith.constant 0 : i32
    return %c0_i32, %c0_i32_0 : i32, i32
  }
  func.func @transform_9(%arg0: i32) -> (i32, i32) {
    %c0_i32 = arith.constant 0 : i32
    %c0_i32_0 = arith.constant 0 : i32
    %c0_i32_1 = arith.constant 0 : i32
    return %c0_i32, %c0_i32_0 : i32, i32
  }
  func.func @transform_10(%arg0: i32) -> (i32, i32) {
    %c0_i32 = arith.constant 0 : i32
    %c0_i32_0 = arith.constant 0 : i32
    %c0_i32_1 = arith.constant 0 : i32
    return %c0_i32, %c0_i32_0 : i32, i32
  }
  func.func @transform_11(%arg0: i32) -> (i32, i32, i32) {
    %c0_i32 = arith.constant 0 : i32
    %c0_i32_0 = arith.constant 0 : i32
    %c0_i32_1 = arith.constant 0 : i32
    return %arg0, %c0_i32, %c0_i32_0 : i32, i32, i32
  }
}

</mosaic_0001>

<bundles_post_ra>
// kernel: tpu_custom_call.1
= control target key start
LH: loop header
LB: loop body
LE: loop exit
PB: predicated region body
PF: predicated region fallthrough
CT: control target
= control target key end

     0   :  { %s3323_s0 = inlined_call_operand.hbm [shape: f32[2,16,128], index: 0, kind: input, shape index: {}]   ;;  %s3324_s1 = inlined_call_operand.hbm [shape: f32[2,16,128], index: 1, kind: input, shape index: {}]   ;;  %s3325_s2 = inlined_call_operand.hbm [shape: f32[2,16,128], index: 2, kind: input, shape index: {}]   ;;  %s3326_s3 = inlined_call_operand.hbm [shape: f32[128,128], index: 3, kind: input, shape index: {}]   ;;  %s3327_s4 = inlined_call_operand.vmem [shape: f32[1,128], index: 4, kind: input, shape index: {}]   ;;  %s3328_s5 = inlined_call_operand.hbm [shape: f32[128,128], index: 5, kind: input, shape index: {}]   ;;  %s3329_s6 = inlined_call_operand.vmem [shape: f32[1,128], index: 6, kind: input, shape index: {}]   ;;  %s3330_s7 = inlined_call_operand.hbm [shape: f32[128,128], index: 7, kind: input, shape index: {}]   ;;  %s3331_s8 = inlined_call_operand.vmem [shape: f32[1,128], index: 8, kind: input, shape index: {}]   ;;  %s3332_s9 = inlined_call_operand.hbm [shape: f32[128,128], index: 9, kind: input, shape index: {}]   ;;  %s3333_s10 = inlined_call_operand.vmem [shape: f32[1,128], index: 10, kind: input, shape index: {}]   ;;  %s3334_s11 = inlined_call_operand.hbm [shape: f32[2,16,128], index: 11, kind: output, shape index: {}]  }
   0x1   :  { %3355 = sst [smem:[#allocation26_spill]] %s3324_s1 }
   0x2   :  { %3356 = sst [smem:[#allocation27_spill]] %s3326_s3 }
   0x3   :  { %3357 = sst [smem:[#allocation28_spill]] %s3330_s7 }
   0x4   :  { %3358 = sst [smem:[#allocation29_spill]] %s3334_s11 }
   0x5   :  { %16 = vsyncpa [#allocation3], 0 }
   0x6   :  { %18 = vsyncpa [#allocation3 + $0x1], 0 }
   0x7   :  { %19 = vsyncpa [#allocation6], 0 }
   0x8   :  { %21 = vsyncpa [#allocation6 + $0x1], 0 }
   0x9   :  { %22 = vsyncpa [#allocation9], 0 }
   0xa   :  { %23 = vsyncpa [#allocation12], 0 }
   0xb   :  { %24 = vsyncpa [#allocation4], 0 }
   0xc   :  { %26 = vsyncpa [#allocation4 + $0x1], 0  ;;  %s2931_s17 = smov 0   ;;  %s2933_s18 = smov 0  }
   0xd   :  { %s2935_s19 = smov 0   ;;  %s2937_s20 = smov 0  }
   0xe LB: > { %3359 = sst [smem:[#allocation20_spill]] %s2842_s17  ;;  %s2952_s21 = sadd.s32 4294967295, %s2854_s20   ;;  %s2854_s20 = sphi %s2937_s20, %s3396_s20   ;;  %s2850_s19 = sphi %s2935_s19, %s3400_s19   ;;  %s2846_s18 = sphi %s2933_s18, %s3399_s18   ;;  %s2842_s17 = sphi %s2931_s17, %s3398_s17  }
   0xf   : > { %3360 = sst [smem:[#allocation21_spill]] %s2854_s20  ;;  %s2085_s22 = sadd.s32 4294967294, %s2854_s20  }
  0x10   : > { %p52_p0 = scmp.ne.s32.totalorder %s2846_s18, %s2842_s17  ;;  %p3346_p1 = scmp.eq.s32.totalorder %s2952_s21, 0 }
  0x11   : > { %p296_p2 = scmp.eq.s32.totalorder %s2952_s21, 1  ;;  %p302_p3 = scmp.eq.s32.totalorder %s2085_s22, 1 }
  0x12   : > { %p2961_p4 = por %p3346_p1, %p52_p0  ;;  %p2086_p5 = scmp.ge.s32.totalorder %s2854_s20, 1 }
  0x13   : > { %p2966_p6 = por %p302_p3, %p52_p0  ;;  %p309_p7 = scmp.lt.s32.totalorder %s2854_s20, 3 }
  0x14   : > { %s3361_s23 = scalar_select %p2961_p4, 1, 0 }
  0x15   : > { %s3362_s24 = scalar_select %p2966_p6, 1, 0 }
  0x16   : > { %p2971_p8 = pnand %p2086_p5, %p309_p7  ;;  %s2856_s26 = smov [#allocation8]  }
  0x17   : > { %3363 = sst [smem:[#allocation22_spill]] %s3362_s24  ;;  %s321_s27 = sshll.u32 %s2856_s26, 4  ;;  %s322_s27 = int_to_ptr.vmem [resolvable:$true] %s321_s27 }
  0x18   : > { %s3364_s25 = scalar_select %p2971_p8, 1, 0 }
  0x19   : > { %p2494_p9 = pneg %p2971_p8  ;;  %s2857_s29 = smov [#allocation11]  }
  0x1a   : > { %s353_s30 = sshll.u32 %s2857_s29, 4  ;;  %s2601_s12 = scalar_lea.vmem %s322_s27, 2048  ;;  %s354_s30 = int_to_ptr.vmem [resolvable:$true] %s353_s30 }
  0x1b   : > { %p2980_p11 = pnand %p2494_p9, %p3346_p1  ;;  %p2602_p13 = scmp.ne.s32.totalorder %s322_s27, %s2601_s12 }
  0x1c   : > { %p2609_p5 = scmp.lt.s32.totalorder %s322_s27, %s322_s27  ;;  %p2610_p7 = scmp.lt.s32.totalorder %s2601_s12, %s2601_s12 }
  0x1d   : > { %s3365_s28 = scalar_select %p2980_p11, 1, 0 }
  0x1e   : > { %p3347_p12 = pneg %p2980_p11  ;;  %p2611_p10 = por %p2610_p7, %p2609_p5 }
  0x20   : > { %p2604_p0 = pnand %p2602_p13, %p3347_p12 }
  0x22   : > { %p2605_p3 = pneg %p2604_p0 }
  0x24   : > { %p2612_p9 = pnand %p2611_p10, %p2605_p3 }
  0x26   : > { %2615 = shalt.err (!%p2612_p9)
}
  0x27   : > { %s3335_s13 = smov 128   ;;  %s3337_s14 = smov 8  }
  0x28   : > { %s3366_s3 = sld [smem:[#allocation27_spill]]  ;;  %s2627_s22 = scalar_lea.vmem %s354_s30, 2048 }
  0x29   : > { %p2628_p13 = scmp.ne.s32.totalorder %s354_s30, %s2627_s22  ;;  %p2635_p10 = scmp.lt.s32.totalorder %s354_s30, %s354_s30 }
  0x2a   : > { %p2636_p3 = scmp.lt.s32.totalorder %s2627_s22, %s2627_s22 }
  0x2b   : > { %p2630_p0 = pnand %p2628_p13, %p3347_p12 }
  0x2c   : > { %p2637_p7 = por %p2636_p3, %p2635_p10 }
  0x2d   : > { %p2631_p5 = pneg %p2630_p0 }
  0x2e   : > { %2497 = dma.hbm_to_vmem [thread:$0]  (!%p2980_p11), %s3366_s3, 2048, %s322_s27, [#allocation9], %s3335_s13, %s3335_s13, %s3337_s14  }
  0x2f   : > { %p2638_p9 = pnand %p2637_p7, %p2631_p5 }
  0x31   : > { %2641 = shalt.err (!%p2638_p9)
}
  0x32   : > { %s3367_s7 = sld [smem:[#allocation28_spill]]  ;;  %s3009_s27 = sadd.s32 1, %s2854_s20  }
  0x33   : > { %3368 = sst [smem:[#allocation23_spill]] %s3009_s27  ;;  %s39_s12 = sadd.s32 1, %s2850_s19 }
  0x34   : > { %s36_s15 = ssub.s32 %s2854_s20, %s3009_s27  ;;  %p46_p13 = scmp.ne.s32.totalorder %s2850_s19, %s2846_s18 }
  0x35   : > { %p37_p0 = scmp.eq.s32.totalorder %s36_s15, 0  ;;  %p47_p5 = scmp.eq.s32.totalorder %s2854_s20, 0 }
  0x36   : > { %p3019_p10 = por %p296_p2, %p46_p13  ;;  %p2525_p3 = scmp.lt.s32.totalorder %s2854_s20, 2 }
  0x37   : > { %s3025_s22 = scalar_select %p37_p0, %s2850_s19, %s39_s12  }
  0x38   : > { %2503 = dma.hbm_to_vmem [thread:$0]  (!%p2980_p11), %s3367_s7, 2048, %s354_s30, [#allocation12], %s3335_s13, %s3335_s13, %s3337_s14  }
  0x39   : > { %s3369_s16 = scalar_select %p3019_p10, 1, 0 }
  0x3a   : > { %3371 = sst [smem:[#allocation25_spill]] %s3025_s22  ;;  %p48_p7 = por %p47_p5, %p46_p13 }
  0x3b   : > { %3370 = sst [smem:[#allocation24_spill]] %s3369_s16  ;;  %s3339_s26 = sand.u32 1, %s2850_s19  }
  0x3c   : > { %s3030_s30 = sshll.u32 %s3339_s26, 4  ;;  %s3033_s29 = sshll.u32 %s2854_s20, 8 }
  0x3d   : > { %p3035_p9 = pnand %p2525_p3, %p48_p7  ;;  %s407_s13 = sand.u32 1, %s2854_s20  }
  0x3e   : > { %s3373_s1 = sld [smem:[#allocation26_spill]]  ;;  %s411_s26 = scalar_lea.vmem [#allocation5], %s3030_s30 }
  0x3f   : > { %s418_s7 = sshll.u32 %s411_s26, 4  ;;  %s2860_s22 = smov [#allocation10]   ;;  %s3047_s7 = int_to_ptr.vmem [resolvable:$true] %s418_s7 }
  0x40   : > { %s3049_s27 = sshll.u32 %s2860_s22, 4  ;;  %s3051_s24 = scalar_lea.sflag [#allocation6], %s407_s13  ;;  %s338_s27 = int_to_ptr.vmem [resolvable:$true] %s3049_s27 }
  0x41   : > { %p3057_p13 = pneg %p3035_p9 }
  0x44   : > { %s3044_s12 = scalar_lea.hbm %s3373_s1, %s3033_s29  ;;  %s2647_s26 = scalar_lea.hbm %s3373_s1, 512 }
  0x45   : > { %s2642_s17 = scalar_lea.hbm %s3044_s12, 256  ;;  %p2648_p3 = scmp.lt.s32.totalorder %s3044_s12, %s3373_s1 }
  0x46   : > { %p2643_p2 = scmp.ne.s32.totalorder %s3044_s12, %s2642_s17  ;;  %p2649_p7 = scmp.lt.s32.totalorder %s2647_s26, %s2642_s17 }
  0x48   : > { %p2645_p0 = pnand %p3057_p13, %p2643_p2  ;;  %p2650_p1 = por %p2649_p7, %p2648_p3 }
  0x4a   : > { %p2646_p5 = pneg %p2645_p0 }
  0x4c   : > { %p2651_p12 = pnand %p2650_p1, %p2646_p5 }
  0x4e   : > { %2654 = shalt.err (!%p2651_p12)
}
  0x4f   : > { %s2655_s13 = scalar_lea.vmem %s3047_s7, 256  ;;  %s2861_s16 = smov [#allocation5]  }
  0x50   : > { %p2656_p6 = scmp.ne.s32.totalorder %s3047_s7, %s2655_s13  ;;  %s2660_s3 = sshll.u32 %s2861_s16, 4  ;;  %s2661_s3 = int_to_ptr.vmem [resolvable:$false] %s2660_s3 }
  0x51   : > { %s2662_s14 = scalar_lea.vmem %s2661_s3, 512  ;;  %p2663_p10 = scmp.lt.s32.totalorder %s3047_s7, %s2661_s3 }
  0x52   : > { %p2658_p2 = pnand %p2656_p6, %p3057_p13  ;;  %p2664_p4 = scmp.lt.s32.totalorder %s2662_s14, %s2655_s13 }
  0x54   : > { %p2659_p0 = pneg %p2658_p2  ;;  %p2665_p8 = por %p2664_p4, %p2663_p10 }
  0x56   : > { %p2666_p11 = pnand %p2665_p8, %p2659_p0 }
  0x58   : > { %2669 = shalt.err (!%p2666_p11)
}
  0x59   : > { %s3375_s11 = smov 8   ;;  %s3376_s17 = smov 128  }
  0x5a   : > { %2513 = dma.hbm_to_vmem [thread:$0]  (!%p3035_p9), %s3044_s12, 256, %s3047_s7, %s3051_s24, %s3376_s17, %s3376_s17, %s3375_s11  }
  0x5b   : > { %s2681_s16 = scalar_lea.vmem %s338_s27, 2048  ;;  %p3377_p6 = scmp.ne.s32.totalorder %s3365_s28, 0 }
  0x5c   : > { %p2682_p1 = scmp.ne.s32.totalorder %s338_s27, %s2681_s16  ;;  %p2689_p8 = scmp.lt.s32.totalorder %s338_s27, %s338_s27 }
  0x5d   : > { %p3378_p12 = pneg %p3377_p6  ;;  %p2690_p11 = scmp.lt.s32.totalorder %s2681_s16, %s2681_s16 }
  0x5f   : > { %p2684_p5 = pnand %p2682_p1, %p3378_p12  ;;  %p2691_p10 = por %p2690_p11, %p2689_p8 }
  0x61   : > { %p2685_p4 = pneg %p2684_p5 }
  0x63   : > { %p2692_p3 = pnand %p2691_p10, %p2685_p4 }
  0x65   : > { %2695 = shalt.err (!%p2692_p3)
}
  0x66   : > { %2500 = dma.hbm_to_vmem [thread:$0]  (!%p3377_p6), %s3328_s5, 2048, %s338_s27, [#allocation9], %s3376_s17, %s3376_s17, %s3375_s11  }
  0x67   : > { %s2862_s7 = smov [#allocation13]   ;;  %p3379_p2 = pmov %p3378_p12 }
  0x68   : > { %s369_s12 = sshll.u32 %s2862_s7, 4  ;;  %s370_s12 = int_to_ptr.vmem [resolvable:$true] %s369_s12 }
  0x69   : > { %s2707_s13 = scalar_lea.vmem %s370_s12, 2048  ;;  %p2715_p12 = scmp.lt.s32.totalorder %s370_s12, %s370_s12 }
  0x6a   : > { %p2708_p7 = scmp.ne.s32.totalorder %s370_s12, %s2707_s13  ;;  %p2716_p5 = scmp.lt.s32.totalorder %s2707_s13, %s2707_s13 }
  0x6c   : > { %p2710_p0 = pnand %p2708_p7, %p3379_p2  ;;  %p2717_p4 = por %p2716_p5, %p2715_p12 }
  0x6e   : > { %p2711_p1 = pneg %p2710_p0 }
  0x70   : > { %p2718_p8 = pnand %p2717_p4, %p2711_p1 }
  0x72   : > { %2721 = shalt.err (!%p2718_p8)
}
  0x73   : > { %2506 = dma.hbm_to_vmem [thread:$0]  (!%p3377_p6), %s3332_s9, 2048, %s370_s12, [#allocation12], %s3376_s17, %s3376_s17, %s3375_s11  }
  0x74   : > { %s3110_s26 = scalar_lea.hbm %s3323_s0, %s3033_s29  ;;  %s390_s28 = scalar_lea.vmem [#allocation2], %s3030_s30 }
  0x75   : > { %s397_s22 = sshll.u32 %s390_s28, 4  ;;  %s3380_s7 = sand.u32 1, %s2850_s19   ;;  %s3113_s22 = int_to_ptr.vmem [resolvable:$true] %s397_s22 }
  0x76   : > { %s387_s13 = scalar_lea.sflag [#allocation3], %s3380_s7  ;;  %s2722_s27 = scalar_lea.hbm %s3110_s26, 256 }
  0x77   : > { %p2723_p11 = scmp.ne.s32.totalorder %s3110_s26, %s2722_s27  ;;  %s2727_s14 = scalar_lea.hbm %s3323_s0, 512 }
  0x78   : > { %p2728_p6 = scmp.lt.s32.totalorder %s3110_s26, %s3323_s0  ;;  %p2729_p7 = scmp.lt.s32.totalorder %s2727_s14, %s2722_s27 }
  0x79   : > { %p2725_p10 = pnand %p2723_p11, %p3057_p13 }
  0x7a   : > { %p2730_p2 = por %p2729_p7, %p2728_p6 }
  0x7b   : > { %p2726_p3 = pneg %p2725_p10 }
  0x7d   : > { %p2731_p0 = pnand %p2730_p2, %p2726_p3 }
  0x7f   : > { %2734 = shalt.err (!%p2731_p0)
}
  0x80   : > { %s2735_s28 = scalar_lea.vmem %s3113_s22, 256  ;;  %s2863_s7 = smov [#allocation2]  }
  0x81   : > { %p2736_p1 = scmp.ne.s32.totalorder %s3113_s22, %s2735_s28  ;;  %s2740_s12 = sshll.u32 %s2863_s7, 4  ;;  %s2741_s12 = int_to_ptr.vmem [resolvable:$false] %s2740_s12 }
  0x82   : > { %s2742_s3 = scalar_lea.vmem %s2741_s12, 512  ;;  %p2743_p4 = scmp.lt.s32.totalorder %s3113_s22, %s2741_s12 }
  0x83   : > { %p2738_p12 = pnand %p2736_p1, %p3057_p13  ;;  %p2744_p8 = scmp.lt.s32.totalorder %s2742_s3, %s2735_s28 }
  0x85   : > { %p2739_p5 = pneg %p2738_p12  ;;  %p2745_p11 = por %p2744_p8, %p2743_p4 }
  0x87   : > { %p2746_p10 = pnand %p2745_p11, %p2739_p5 }
  0x89   : > { %2749 = shalt.err (!%p2746_p10)
}
  0x8a   : > { %2510 = dma.hbm_to_vmem [thread:$0]  (!%p3035_p9), %s3110_s26, 256, %s3113_s22, %s387_s13, %s3376_s17, %s3376_s17, %s3375_s11  }
  0x8b   : > { %s3144_s14 = scalar_lea.hbm %s3325_s2, %s3033_s29  ;;  %s432_s16 = scalar_lea.vmem [#allocation7], %s3030_s30 }
  0x8c   : > { %s439_s28 = sshll.u32 %s432_s16, 4  ;;  %s2750_s7 = scalar_lea.hbm %s3144_s14, 256  ;;  %s440_s28 = int_to_ptr.vmem [resolvable:$true] %s439_s28 }
  0x8d   : > { %p2751_p3 = scmp.ne.s32.totalorder %s3144_s14, %s2750_s7  ;;  %s2755_s26 = scalar_lea.hbm %s3325_s2, 512 }
  0x8e   : > { %p2756_p2 = scmp.lt.s32.totalorder %s3144_s14, %s3325_s2  ;;  %p2757_p0 = scmp.lt.s32.totalorder %s2755_s26, %s2750_s7 }
  0x8f   : > { %p2753_p6 = pnand %p2751_p3, %p3057_p13 }
  0x90   : > { %p2758_p1 = por %p2757_p0, %p2756_p2 }
  0x91   : > { %p2754_p7 = pneg %p2753_p6 }
  0x93   : > { %p2759_p12 = pnand %p2758_p1, %p2754_p7 }
  0x95   : > { %2762 = shalt.err (!%p2759_p12)
}
  0x96   : > { %s2763_s30 = scalar_lea.vmem %s440_s28, 256  ;;  %s2864_s29 = smov [#allocation7]  }
  0x97   : > { %p2764_p5 = scmp.ne.s32.totalorder %s440_s28, %s2763_s30  ;;  %s2768_s1 = sshll.u32 %s2864_s29, 4  ;;  %s2769_s1 = int_to_ptr.vmem [resolvable:$false] %s2768_s1 }
  0x98   : > { %s2770_s27 = scalar_lea.vmem %s2769_s1, 512  ;;  %p2771_p11 = scmp.lt.s32.totalorder %s440_s28, %s2769_s1 }
  0x99   : > { %p2766_p4 = pnand %p2764_p5, %p3057_p13  ;;  %p2772_p10 = scmp.lt.s32.totalorder %s2770_s27, %s2763_s30 }
  0x9b   : > { %p2767_p8 = pneg %p2766_p4  ;;  %p2773_p3 = por %p2772_p10, %p2771_p11 }
  0x9d   : > { %p2774_p6 = pnand %p2773_p3, %p2767_p8 }
  0x9f   : > { %2777 = shalt.err (!%p2774_p6)
}
  0xa0   : > { %2516 = dma.hbm_to_vmem [thread:$0]  (!%p3035_p9), %s3144_s14, 256, %s440_s28, %s3051_s24, %s3376_s17, %s3376_s17, %s3375_s11  }
  0xa1   : > { %p3381_p13 = scmp.ne.s32.totalorder %s3364_s25, 0 }
  0xa2   : > { %s3170_s20 = sand.u32 (!%p3381_p13), 1, %s2846_s18   ;;  %p3382_p7 = scmp.ne.s32.totalorder (!%p3381_p13), %s3361_s23, 0 }
  0xa3   : > { %451 = sbr.rel (%p3381_p13) target bundleno = 1874 (0x752), region = 64  ;;  %s3173_s16 = sshll.u32 (!%p3381_p13), %s3170_s20, 4 }
  0xa4   : > { %s454_s7 = scalar_lea.sflag (!%p3381_p13), [#allocation3], %s3170_s20  ;;  %s457_s15 = scalar_lea.vmem (!%p3381_p13), [#allocation2], %s3173_s16 }
  0xa8   : > { %2821 = dma.done.wait (%p3382_p7), %s454_s7, 256  }
  0xa9   : > { %2823 = vsyncadd (%p3382_p7), %s454_s7, 4294967040  ;;  %s462_s24 = sand.u32 1, %s2952_s21   ;;  %s466_s11 = scalar_lea.vmem [#allocation5], %s3173_s16 }
  0xaa   : > { %s463_s25 = scalar_lea.sflag [#allocation6], %s462_s24 }
  0xab   : > { %2825 = dma.done.wait (%p3382_p7), %s463_s25, 512  }
  0xac   : > { %2827 = vsyncadd (%p3382_p7), %s463_s25, 4294966784  ;;  %s475_s17 = scalar_lea.vmem [#allocation7], %s3173_s16  ;;  %p3383_p9 = scmp.eq.s32.totalorder %s2952_s21, 0 }
  0xae   : > { %2829 = dma.done.wait (%p3383_p9), [#allocation9], 4096   ;;  %p3384_p2 = pmov %p3383_p9 }
  0xb0   : > { %2831 = vsyncadd (%p3384_p2), [#allocation9], 4294963200  ;;  %p3385_p0 = pmov %p3384_p2 }
  0xb2   : > { %2833 = dma.done.wait (%p3385_p0), [#allocation12], 4096   ;;  %p3386_p1 = pmov %p3385_p0 }
  0xb3   : > { %v561_v0 = vld [vmem:[#allocation8 + $0x78] sm:$0xff]  ;;  %v560_v2 = vld [vmem:[#allocation8 + $0x70] sm:$0xff]  ;;  %v559_v4 = vld [vmem:[#allocation8 + $0x68] sm:$0xff]  ;;  %vm840_vm0 = vcmask 261120   ;;  %s2865_s3 = smov 96   ;;  %s2866_s13 = smov 64  }
  0xb4   : > { %2835 = vsyncadd (%p3386_p1), [#allocation12], 4294963200  ;;  %v659_v1 = vld [vmem:[#allocation10 + $0x78] sm:$0xff]  ;;  %2265 = vmatprep.subr.mxu0 %v561_v0  ;;  %v658_v3 = vld [vmem:[#allocation10 + $0x70] sm:$0xff]  ;;  %s2867_s30 = smov 32   ;;  %vm932_vm1 = vcmask 130048  }
  0xb5   : > { %2300 = vmatprep.subr.mxu1 %v659_v1  ;;  %2266 = vmatpush3.msra.mxu0 %v561_v0  ;;  %v657_v5 = vld [vmem:[#allocation10 + $0x68] sm:$0xff]  ;;  %v558_v6 = vld [vmem:[#allocation8 + $0x60] sm:$0xff]  ;;  %v557_v8 = vld [vmem:[#allocation8 + $0x58] sm:$0xff]  ;;  %s3387_s27 = sld [smem:[#allocation24_spill]]  ;;  %s539_s7 = scalar_lea.vmem [#allocation14], %s3173_s16 }
  0xb6   : > { %2301 = vmatpush3.msra.mxu1 %v659_v1  ;;  %2267 = vmatprep.subr.mxu0 %v560_v2  ;;  %v656_v7 = vld [vmem:[#allocation10 + $0x60] sm:$0xff]  ;;  %v655_v9 = vld [vmem:[#allocation10 + $0x58] sm:$0xff]  ;;  %v556_v10 = vld [vmem:[#allocation8 + $0x50] sm:$0xff]  ;;  %s2154_s24 = sshll.u32 %s2952_s21, 8  ;;  %s1918_s16 = scalar_lea.sflag [#allocation4], %s3170_s20 }
  0xb7   : > { %2302 = vmatprep.subr.mxu1 %v658_v3  ;;  %2268 = vmatpush3.msra.mxu0 %v560_v2  ;;  %v654_v11 = vld [vmem:[#allocation10 + $0x50] sm:$0xff]  ;;  %v555_v12 = vld [vmem:[#allocation8 + $0x48] sm:$0xff]  ;;  %v554_v14 = vld [vmem:[#allocation8 + $0x40] sm:$0xff]  ;;  %s2868_s21 = smov [#allocation14]  }
  0xb8   : > { %2303 = vmatpush3.msra.mxu1 %v658_v3  ;;  %2269 = vmatprep.subr.mxu0 %v559_v4  ;;  %v653_v13 = vld [vmem:[#allocation10 + $0x48] sm:$0xff]  ;;  %v652_v15 = vld [vmem:[#allocation10 + $0x40] sm:$0xff]  ;;  %v553_v16 = vld [vmem:[#allocation8 + $0x38] sm:$0xff]  ;;  %s2782_s12 = sshll.u32 %s2868_s21, 4  ;;  %s2783_s12 = int_to_ptr.vmem [resolvable:$false] %s2782_s12 }
  0xb9   : > { %2304 = vmatprep.subr.mxu1 %v657_v5  ;;  %2270 = vmatpush3.msra.mxu0 %v559_v4  ;;  %v651_v17 = vld [vmem:[#allocation10 + $0x38] sm:$0xff]  ;;  %v552_v18 = vld [vmem:[#allocation8 + $0x30] sm:$0xff]  ;;  %v551_v20 = vld [vmem:[#allocation8 + $0x28] sm:$0xff] }
  0xba   : > { %2305 = vmatpush3.msra.mxu1 %v657_v5  ;;  %2271 = vmatprep.subr.mxu0 %v558_v6  ;;  %v650_v19 = vld [vmem:[#allocation10 + $0x30] sm:$0xff]  ;;  %v649_v21 = vld [vmem:[#allocation10 + $0x28] sm:$0xff]  ;;  %v550_v22 = vld [vmem:[#allocation8 + $0x20] sm:$0xff] }
  0xbb   : > { %2306 = vmatprep.subr.mxu1 %v656_v7  ;;  %2272 = vmatpush3.msra.mxu0 %v558_v6  ;;  %v648_v23 = vld [vmem:[#allocation10 + $0x20] sm:$0xff]  ;;  %v549_v24 = vld [vmem:[#allocation8 + $0x18] sm:$0xff]  ;;  %v548_v26 = vld [vmem:[#allocation8 + $0x10] sm:$0xff]  ;;  %p3390_p5 = scmp.ne.s32.totalorder %s3387_s27, 0 }
  0xbc   : > { %2307 = vmatpush3.msra.mxu1 %v656_v7  ;;  %2273 = vmatprep.subr.mxu0 %v557_v8  ;;  %v647_v25 = vld [vmem:[#allocation10 + $0x18] sm:$0xff]  ;;  %v646_v27 = vld [vmem:[#allocation10 + $0x10] sm:$0xff]  ;;  %v547_v28 = vld [vmem:[#allocation8 + $0x8] sm:$0xff] }
  0xbd   : > { %2308 = vmatprep.subr.mxu1 %v655_v9  ;;  %2274 = vmatpush3.msra.mxu0 %v557_v8  ;;  %v645_v29 = vld [vmem:[#allocation10 + $0x8] sm:$0xff]  ;;  %v546_v30 = vld [vmem:[#allocation8] sm:$0xff]  ;;  %v757_v36 = vld [vmem:[#allocation11 + $0x78] sm:$0xff] }
  0xbe   : > { %2309 = vmatpush3.msra.mxu1 %v655_v9  ;;  %2275 = vmatprep.subr.mxu0 %v556_v10  ;;  %v644_v31 = vld [vmem:[#allocation10] sm:$0xff]  ;;  %v541_v34 = vld [vmem:[%s457_s15 + $0x8] sm:$0xff]  ;;  %v756_v38 = vld [vmem:[#allocation11 + $0x70] sm:$0xff] }
  0xbf   : > { %2310 = vmatprep.subr.mxu1 %v654_v11  ;;  %2276 = vmatpush3.msra.mxu0 %v556_v10  ;;  %v540_v32 = vld [vmem:[%s457_s15] sm:$0xff]  ;;  %v543_v35 = vld [vmem:[%s466_s11 + $0x8] sm:$0xff]  ;;  %s1931_s15 = sshll.u32 %s539_s7, 4  ;;  %s3275_s15 = int_to_ptr.vmem [resolvable:$true] %s1931_s15 }
  0xc0   : > { %2311 = vmatpush3.msra.mxu1 %v654_v11  ;;  %2277 = vmatprep.subr.mxu0 %v555_v12  ;;  %v542_v33 = vld [vmem:[%s466_s11] sm:$0xff]  ;;  %v755_v39 = vld [vmem:[#allocation11 + $0x68] sm:$0xff]  ;;  %v753_v41 = vld [vmem:[#allocation11 + $0x58] sm:$0xff]  ;;  %s2778_s28 = scalar_lea.vmem %s3275_s15, 256  ;;  %p2785_p11 = scmp.lt.s32.totalorder %s3275_s15, %s2783_s12 }
  0xc1   : > { %2312 = vmatprep.subr.mxu1 %v653_v13  ;;  %2278 = vmatpush3.msra.mxu0 %v555_v12  ;;  %v544_v37 = vld [vmem:[%s475_s17] sm:$0xff]  ;;  %v751_v43 = vld [vmem:[#allocation11 + $0x48] sm:$0xff]  ;;  %v749_v45 = vld [vmem:[#allocation11 + $0x38] sm:$0xff]  ;;  %p2779_p12 = scmp.ne.s32.totalorder %s3275_s15, %s2778_s28 }
  0xc2   : > { %2313 = vmatpush3.msra.mxu1 %v653_v13  ;;  %2279 = vmatprep.subr.mxu0 %v554_v14  ;;  %v754_v40 = vld [vmem:[#allocation11 + $0x60] sm:$0xff]  ;;  %v752_v42 = vld [vmem:[#allocation11 + $0x50] sm:$0xff]  ;;  %v747_v47 = vld [vmem:[#allocation11 + $0x28] sm:$0xff] }
  0xc3   : > { %2314 = vmatprep.subr.mxu1 %v652_v15  ;;  %2280 = vmatpush3.msra.mxu0 %v554_v14  ;;  %v750_v44 = vld [vmem:[#allocation11 + $0x40] sm:$0xff]  ;;  %v748_v46 = vld [vmem:[#allocation11 + $0x30] sm:$0xff]  ;;  %v745_v49 = vld [vmem:[#allocation11 + $0x18] sm:$0xff]  ;;  %p2780_p4 = pnand %p2779_p12, %p3390_p5 }
  0xc4   : > { %2315 = vmatpush3.msra.mxu1 %v652_v15  ;;  %2281 = vmatprep.subr.mxu0 %v553_v16  ;;  %v746_v48 = vld [vmem:[#allocation11 + $0x20] sm:$0xff]  ;;  %v744_v50 = vld [vmem:[#allocation11 + $0x10] sm:$0xff]  ;;  %v743_v51 = vld [vmem:[#allocation11 + $0x8] sm:$0xff] }
  0xc5   : > { %2316 = vmatprep.subr.mxu1 %v651_v17  ;;  %2282 = vmatpush3.msra.mxu0 %v553_v16  ;;  %v742_v52 = vld [vmem:[#allocation11] sm:$0xff]  ;;  %v545_v53 = vld [vmem:[%s475_s17 + $0x8] sm:$0xff]  ;;  %v1016_v1 = vld [vmem:[#allocation13 + $0x10] sm:$0xff]  ;;  %s3388_s17 = sld [smem:[#allocation29_spill]]  ;;  %p2781_p8 = pneg %p2780_p4 }
  0xc6   : > { %2317 = vmatpush3.msra.mxu1 %v651_v17  ;;  %2283 = vmatprep.subr.mxu0 %v552_v18  ;;  %v2111_v54 = vld [vmem:[%s3329_s6] ss:$0 sm:$0xff]  ;;  %v1017_v0 = vld [vmem:[#allocation13 + $0x18] sm:$0xff]  ;;  %v1015_v2 = vld [vmem:[#allocation13 + $0x8] sm:$0xff] }
  0xc7   : > { %2318 = vmatprep.subr.mxu1 %v650_v19  ;;  %2284 = vmatpush3.msra.mxu0 %v552_v18  ;;  %v2110_v56 = vld [vmem:[%s3327_s4] ss:$0 sm:$0xff] }
  0xc8   : > { %2319 = vmatpush3.msra.mxu1 %v650_v19  ;;  %2285 = vmatprep.subr.mxu0 %v551_v20  ;;  %v2112_v3 = vld [vmem:[%s3331_s8] ss:$0 sm:$0xff] }
  0xc9   : > { %2320 = vmatprep.subr.mxu1 %v649_v21  ;;  %2286 = vmatpush3.msra.mxu0 %v551_v20  ;;  %v1014_v4 = vld [vmem:[#allocation13] sm:$0xff] }
  0xca   : > { %2321 = vmatpush3.msra.mxu1 %v649_v21  ;;  %2287 = vmatprep.subr.mxu0 %v550_v22 }
  0xcb   : > { %2322 = vmatprep.subr.mxu1 %v648_v23  ;;  %2288 = vmatpush3.msra.mxu0 %v550_v22  ;;  %s3389_s23 = smov %s3388_s17  ;;  %s3280_s14 = scalar_lea.hbm %s3388_s17, %s2154_s24 }
  0xcc   : > { %2323 = vmatpush3.msra.mxu1 %v648_v23  ;;  %2289 = vmatprep.subr.mxu0 %v549_v24 }
  0xcd   : > { %2324 = vmatprep.subr.mxu1 %v647_v25  ;;  %2290 = vmatpush3.msra.mxu0 %v549_v24  ;;  %v1205_v24 = vld [vmem:[#allocation13 + $0x38] sm:$0xff] }
  0xce   : > { %2325 = vmatpush3.msra.mxu1 %v647_v25  ;;  %2291 = vmatprep.subr.mxu0 %v548_v26 }
  0xcf   : > { %2326 = vmatprep.subr.mxu1 %v646_v27  ;;  %2292 = vmatpush3.msra.mxu0 %v548_v26 }
  0xd0   : > { %2327 = vmatpush3.msra.mxu1 %v646_v27  ;;  %2293 = vmatprep.subr.mxu0 %v547_v28 }
  0xd1   : > { %2328 = vmatprep.subr.mxu1 %v645_v29  ;;  %2294 = vmatpush3.msra.mxu0 %v547_v28 }
  0xd2   : > { %2329 = vmatpush3.msra.mxu1 %v645_v29  ;;  %2295 = vmatprep.subr.mxu0 %v546_v30 }
  0xd3   : > { %2330 = vmatprep.subr.mxu1 %v644_v31  ;;  %2296 = vmatpush3.msra.mxu0 %v546_v30 }
  0xd4   : > { %2297 = vmatprep.mubr.f32.mxu0 %v540_v32  ;;  %2331 = vmatpush3.msra.mxu1 %v644_v31 }
  0xd5   : > { %2332 = vmatprep.mubr.f32.mxu1 %v542_v33  ;;  %2298 = vmatmul.mubr.f32.vlgmr.msra.gmra.mxu0 %v541_v34 }
  0xd6   : > { %2333 = vmatmul.mubr.f32.vlgmr.msra.gmra.mxu1 %v543_v35  ;;  %2335 = vmatprep.subr.mxu0 %v757_v36 }
  0xd7   : > { %2367 = vmatprep.mubr.f32.mxu0 %v544_v37  ;;  %2336 = vmatpush3.msra.mxu0 %v757_v36 }
  0xd8   : > { %2337 = vmatprep.subr.mxu0 %v756_v38 }
  0xd9   : > { %2338 = vmatpush3.msra.mxu0 %v756_v38  ;;  %v1204_v38 = vld [vmem:[#allocation13 + $0x30] sm:$0xff] }
  0xda   : > { %2339 = vmatprep.subr.mxu0 %v755_v39 }
  0xdb   : > { %2340 = vmatpush3.msra.mxu0 %v755_v39  ;;  %v1203_v39 = vld [vmem:[#allocation13 + $0x28] sm:$0xff] }
  0xdc   : > { %2341 = vmatprep.subr.mxu0 %v754_v40 }
  0xdd   : > { %2342 = vmatpush3.msra.mxu0 %v754_v40  ;;  %v1202_v40 = vld [vmem:[#allocation13 + $0x20] sm:$0xff] }
  0xde   : > { %2343 = vmatprep.subr.mxu0 %v753_v41 }
  0xdf   : > { %2344 = vmatpush3.msra.mxu0 %v753_v41 }
  0xe0   : > { %2345 = vmatprep.subr.mxu0 %v752_v42 }
  0xe1   : > { %2346 = vmatpush3.msra.mxu0 %v752_v42 }
  0xe2   : > { %2347 = vmatprep.subr.mxu0 %v751_v43 }
  0xe3   : > { %2348 = vmatpush3.msra.mxu0 %v751_v43 }
  0xe4   : > { %2349 = vmatprep.subr.mxu0 %v750_v44 }
  0xe5   : > { %2350 = vmatpush3.msra.mxu0 %v750_v44 }
  0xe6   : > { %2351 = vmatprep.subr.mxu0 %v749_v45 }
  0xe7   : > { %2352 = vmatpush3.msra.mxu0 %v749_v45  ;;  %v1553_v45 = vld [vmem:[#allocation13 + $0x58] sm:$0xff] }
  0xe8   : > { %2353 = vmatprep.subr.mxu0 %v748_v46 }
  0xe9   : > { %2354 = vmatpush3.msra.mxu0 %v748_v46 }
  0xea   : > { %2355 = vmatprep.subr.mxu0 %v747_v47 }
  0xeb   : > { %2356 = vmatpush3.msra.mxu0 %v747_v47 }
  0xec   : > { %2357 = vmatprep.subr.mxu0 %v746_v48 }
  0xed   : > { %2358 = vmatpush3.msra.mxu0 %v746_v48 }
  0xee   : > { %2359 = vmatprep.subr.mxu0 %v745_v49 }
  0xef   : > { %2360 = vmatpush3.msra.mxu0 %v745_v49 }
  0xf0   : > { %2361 = vmatprep.subr.mxu0 %v744_v50 }
  0xf1   : > { %2362 = vmatpush3.msra.mxu0 %v744_v50 }
  0xf2   : > { %2363 = vmatprep.subr.mxu0 %v743_v51 }
  0xf3   : > { %2364 = vmatpush3.msra.mxu0 %v743_v51 }
  0xf4   : > { %2365 = vmatprep.subr.mxu0 %v742_v52 }
  0xf5   : > { %2366 = vmatpush3.msra.mxu0 %v742_v52 }
  0xf6   : > { %2368 = vmatmul.mubr.f32.vlgmr.msra.gmra.mxu0 %v545_v53  ;;  %2409 = vmatprep.subr.mxu0 %v1017_v0 }
  0xf7   : > { %2410 = vmatpush3.msra.mxu0 %v1017_v0 }
  0xf8   : > { %2411 = vmatprep.subr.mxu0 %v1016_v1 }
  0xf9   : > { %2412 = vmatpush3.msra.mxu0 %v1016_v1 }
  0xfa   : > { %2413 = vmatprep.subr.mxu0 %v1015_v2 }
  0xfb   : > { %2414 = vmatpush3.msra.mxu0 %v1015_v2 }
  0xfc   : > { %2415 = vmatprep.subr.mxu0 %v1014_v4 }
  0xfd   : > { %2416 = vmatpush3.msra.mxu0 %v1014_v4 }
 0x195   : > { %v2299_v55 = vpop.f32.mrf.mxu0 }
 0x196   : > { %v2334_v57 = vpop.f32.mrf.mxu1  ;;  %v641_v63 = vadd.f32 %v2299_v55, %v2110_v56  ;;  %v1551_v55 = vld [vmem:[#allocation13 + $0x48] sm:$0xff] }
 0x197   : > { %v739_v58 = vadd.f32 %v2334_v57, %v2111_v54  ;;  %v635_v59 = vpop.f32.mrf.mxu0 }
 0x198   : > { %v733_v60 = vpop.f32.mrf.mxu1  ;;  %v636_v61 = vadd.f32 %v2110_v56, %v635_v59  ;;  %v1550_v56 = vld [vmem:[#allocation13 + $0x40] sm:$0xff] }
 0x199   : > { %v734_v62 = vadd.f32 %v2111_v54, %v733_v60  ;;  %1024 = vrot.lane.b32.xlu0 %v739_v58, %s2865_s3  ;;  %2370 = vmatprep.subr.msk.mxu1 %vm840_vm0, %v739_v58  ;;  %v1552_v54 = vld [vmem:[#allocation13 + $0x50] sm:$0xff] }
 0x19a   : > { %2371 = vmatpush3.xpose.msk.msra.mxu1 %vm840_vm0, %v739_v58  ;;  %1018 = vrot.lane.b32.xlu1 %v636_v61, %s2865_s3 }
 0x19b   : > { %2372 = vmatprep.subr.msk.mxu1 %vm840_vm0, %v734_v62  ;;  %2374 = vmatprep.mubr.msk.f32.mxu1 %vm840_vm0, %v636_v61 }
 0x19d   : > { %1022 = vrot.lane.b32.xlu0 %v734_v62, %s2865_s3 }
 0x19e   : > { %2373 = vmatpush3.xpose.msk.msra.mxu1 %vm840_vm0, %v734_v62  ;;  %1020 = vrot.lane.b32.xlu1 %v641_v63, %s2865_s3 }
 0x1a1   : > { %2375 = vmatmul.mubr.msk.f32.vlgmr.msra.gmra.mxu1 %vm840_vm0, %v641_v63 }
 0x1b6   : > { %v2369_v5 = vpop.f32.mrf.mxu0 }
 0x1b7   : > { %v837_v6 = vadd.f32 %v2369_v5, %v2112_v3  ;;  %v1822_v5 = vld [vmem:[#allocation13 + $0x78] sm:$0xff] }
 0x1b8   : > { %v831_v7 = vpop.f32.mrf.mxu0 }
 0x1b9   : > { %v832_v8 = vadd.f32 %v2112_v3, %v831_v7  ;;  %1117 = vrot.lane.b32.xlu0 %v837_v6, %s2865_s3  ;;  %2377 = vmatprep.subr.mxu1 %v837_v6  ;;  %v1820_v7 = vld [vmem:[#allocation13 + $0x68] sm:$0xff] }
 0x1ba   : > { %2378 = vmatpush3.msra.mxu1 %v837_v6 }
 0x1bb   : > { %1115 = vrot.lane.b32.xlu1 %v832_v8, %s2865_s3  ;;  %2379 = vmatprep.subr.mxu1 %v832_v8  ;;  %s2784_s3 = scalar_lea.vmem %s2783_s12, 512 }
 0x1bc   : > { %2380 = vmatpush3.msra.mxu1 %v832_v8  ;;  %p2786_p10 = scmp.lt.s32.totalorder %s2784_s3, %s2778_s28 }
 0x1bd   : > { %1374 = vrot.lane.b32.xlu0 %v739_v58, %s2866_s13 }
 0x1be   : > { %p2787_p3 = por %p2786_p10, %p2785_p11 }
 0x1bf   : > { %1372 = vrot.lane.b32.xlu1 %v734_v62, %s2866_s13 }
 0x1c0   : > { %p2788_p6 = pnand %p2787_p3, %p2781_p8 }
 0x1c1   : > { %1368 = vrot.lane.b32.xlu0 %v636_v61, %s2866_s13 }
 0x1c3   : > { %1370 = vrot.lane.b32.xlu1 %v641_v63, %s2866_s13 }
 0x1c5   : > { %1643 = vrot.lane.b32.xlu0 %v739_v58, %s2867_s30 }
 0x1c7   : > { %1641 = vrot.lane.b32.xlu1 %v734_v62, %s2867_s30 }
 0x1c9   : > { %1637 = vrot.lane.b32.xlu0 %v636_v61, %s2867_s30 }
 0x1cb   : > { %1639 = vrot.lane.b32.xlu1 %v641_v63, %s2867_s30 }
 0x1cd   : > { %1465 = vrot.lane.b32.xlu0 %v837_v6, %s2866_s13 }
 0x1cf   : > { %1463 = vrot.lane.b32.xlu1 %v832_v8, %s2866_s13 }
 0x1d1   : > { %1734 = vrot.lane.b32.xlu0 %v837_v6, %s2867_s30  ;;  %v1821_v6 = vld [vmem:[#allocation13 + $0x70] sm:$0xff] }
 0x1d3   : > { %1732 = vrot.lane.b32.xlu1 %v832_v8, %s2867_s30  ;;  %v1819_v8 = vld [vmem:[#allocation13 + $0x60] sm:$0xff] }
 0x20b   : > { %v1025_v9 = vpop.permute.xlu0 %1024 }
 0x20c   : > { %2384 = vmatprep.subr.msk.mxu1 %vm840_vm0, %v1025_v9  ;;  %v1019_v21 = vpop.permute.xlu1 %1018 }
 0x20f   : > { %v1023_v10 = vpop.permute.xlu0 %1022 }
 0x210   : > { %v1021_v22 = vpop.permute.xlu1 %1020 }
 0x22b   : > { %v1118_v11 = vpop.permute.xlu0 %1117 }
 0x22d   : > { %v1116_v23 = vpop.permute.xlu1 %1115 }
 0x22f   : > { %v3230_v12 = vpop.permute.xlu0 %1374 }
 0x231   : > { %v1373_v25 = vpop.permute.xlu1 %1372 }
 0x233   : > { %v3232_v13 = vpop.permute.xlu0 %1368 }
 0x235   : > { %v1371_v26 = vpop.permute.xlu1 %1370 }
 0x237   : > { %v1644_v14 = vpop.permute.xlu0 %1643 }
 0x238   : > { %2445 = vmatprep.subr.msk.mxu0 %vm840_vm0, %v1644_v14 }
 0x239   : > { %v1642_v30 = vpop.permute.xlu1 %1641 }
 0x23b   : > { %v1638_v29 = vpop.permute.xlu0 %1637 }
 0x23d   : > { %v1640_v34 = vpop.permute.xlu1 %1639 }
 0x23f   : > { %v1466_v43 = vpop.permute.xlu0 %1465 }
 0x241   : > { %v1464_v44 = vpop.permute.xlu1 %1463 }
 0x243   : > { %v1735_v57 = vpop.permute.xlu0 %1734 }
 0x245   : > { %v1733_v3 = vpop.permute.xlu1 %1732 }
 0x261   : > { %v2376_v15 = vpop.f32.mrf.mxu1 }
 0x262   : > { %v929_v16 = vmul.f32 0.17677669, %v2376_v15 }
 0x263   : > { %v919_v17 = vpop.f32.mrf.mxu1 }
 0x264   : > { %v928_v18 = vmul.f32 0.17677669, %v919_v17 }
 0x266   : > { %2574 = vtanh.f32 %v928_v18  ;;  %v2145_v18 = vld [vmem:[%s3333_s10] ss:$0 sm:$0xff] }
 0x267   : > { %2576 = vtanh.f32 %v929_v16 }
 0x273   : > { %v2575_v19 = vpop.eup %2574 }
 0x274   : > { %v2577_v20 = vpop.eup %2576  ;;  %2381 = vmatprep.mubr.msk.f32.mxu1 %vm932_vm1, %v2575_v19 }
 0x275   : > { %2382 = vmatmul.mubr.msk.f32.vlgmr.msra.gmra.mxu1 %vm932_vm1, %v2577_v20 }
 0x276   : > { %2385 = vmatpush3.xpose.msk.msra.mxu1 %vm840_vm0, %v1025_v9  ;;  %2388 = vmatprep.mubr.msk.f32.mxu1 %vm840_vm0, %v1019_v21 }
 0x277   : > { %2386 = vmatprep.subr.msk.mxu1 %vm840_vm0, %v1023_v10 }
 0x27a   : > { %2387 = vmatpush3.xpose.msk.msra.mxu1 %vm840_vm0, %v1023_v10 }
 0x27b   : > { %2391 = vmatprep.subr.mxu1 %v1118_v11 }
 0x27d   : > { %2389 = vmatmul.mubr.msk.f32.vlgmr.msra.gmra.mxu1 %vm840_vm0, %v1021_v22 }
 0x27e   : > { %2392 = vmatpush3.msra.mxu1 %v1118_v11 }
 0x27f   : > { %2393 = vmatprep.subr.mxu1 %v1116_v23 }
 0x280   : > { %2394 = vmatpush3.msra.mxu1 %v1116_v23 }
 0x281   : > { %2398 = vmatprep.subr.mxu1 %v1205_v24 }
 0x335   : > { %v2383_v27 = vpop.f32.mrf.mxu1 }
 0x337   : > { %v1005_v28 = vpop.f32.mrf.mxu1 }
 0x338   : > { %2417 = vmatprep.mubr.msk.f32.mxu0 %vm840_vm0, %v1005_v28 }
 0x339   : > { %2418 = vmatmul.mubr.msk.f32.vlgmr.msra.gmra.mxu0 %vm840_vm0, %v2383_v27 }
 0x33a   : > { %2446 = vmatpush3.xpose.msk.msra.mxu0 %vm840_vm0, %v1644_v14  ;;  %2449 = vmatprep.mubr.msk.f32.mxu0 %vm840_vm0, %v1638_v29 }
 0x33b   : > { %2447 = vmatprep.subr.msk.mxu0 %vm840_vm0, %v1642_v30 }
 0x33d   : > { %v2390_v31 = vpop.f32.mrf.mxu1 }
 0x33e   : > { %2448 = vmatpush3.xpose.msk.msra.mxu0 %vm840_vm0, %v1642_v30  ;;  %v1110_v32 = vmul.f32 0.17677669, %v2390_v31 }
 0x33f   : > { %v1100_v33 = vpop.f32.mrf.mxu1  ;;  %2459 = vmatprep.subr.mxu0 %v1822_v5 }
 0x340   : > { %v1109_v35 = vmul.f32 0.17677669, %v1100_v33 }
 0x341   : > { %2450 = vmatmul.mubr.msk.f32.vlgmr.msra.gmra.mxu0 %vm840_vm0, %v1640_v34 }
 0x342   : > { %2578 = vtanh.f32 %v1109_v35  ;;  %2460 = vmatpush3.msra.mxu0 %v1822_v5 }
 0x343   : > { %2580 = vtanh.f32 %v1110_v32  ;;  %2461 = vmatprep.subr.mxu0 %v1821_v6 }
 0x344   : > { %2462 = vmatpush3.msra.mxu0 %v1821_v6 }
 0x345   : > { %2463 = vmatprep.subr.mxu0 %v1820_v7 }
 0x346   : > { %2464 = vmatpush3.msra.mxu0 %v1820_v7 }
 0x347   : > { %2465 = vmatprep.subr.mxu0 %v1819_v8 }
 0x348   : > { %2466 = vmatpush3.msra.mxu0 %v1819_v8 }
 0x34f   : > { %v2579_v36 = vpop.eup %2578 }
 0x350   : > { %v2581_v37 = vpop.eup %2580  ;;  %2395 = vmatprep.mubr.msk.f32.mxu1 %vm932_vm1, %v2579_v36 }
 0x351   : > { %2396 = vmatmul.mubr.msk.f32.vlgmr.msra.gmra.mxu1 %vm932_vm1, %v2581_v37 }
 0x352   : > { %2399 = vmatpush3.msra.mxu1 %v1205_v24 }
 0x353   : > { %2400 = vmatprep.subr.mxu1 %v1204_v38 }
 0x354   : > { %2401 = vmatpush3.msra.mxu1 %v1204_v38 }
 0x355   : > { %2402 = vmatprep.subr.mxu1 %v1203_v39 }
 0x356   : > { %2403 = vmatpush3.msra.mxu1 %v1203_v39 }
 0x357   : > { %2404 = vmatprep.subr.mxu1 %v1202_v40 }
 0x358   : > { %2405 = vmatpush3.msra.mxu1 %v1202_v40 }
 0x359   : > { %2420 = vmatprep.subr.msk.mxu1 %vm840_vm0, %v3230_v12 }
 0x3f9   : > { %v2419_v58 = vpop.f32.mrf.mxu0 }
 0x3fb   : > { %v1359_v59 = vpop.f32.mrf.mxu0 }
 0x401   : > { %v2451_v60 = vpop.f32.mrf.mxu0 }
 0x402   : > { %v1729_v63 = vmul.f32 0.17677669, %v2451_v60 }
 0x403   : > { %v1719_v61 = vpop.f32.mrf.mxu0 }
 0x404   : > { %v1728_v62 = vmul.f32 0.17677669, %v1719_v61 }
 0x411   : > { %v2397_v41 = vpop.f32.mrf.mxu1 }
 0x413   : > { %v1193_v42 = vpop.f32.mrf.mxu1 }
 0x414   : > { %2406 = vmatprep.mubr.msk.f32.mxu1 %vm840_vm0, %v1193_v42 }
 0x415   : > { %2407 = vmatmul.mubr.msk.f32.vlgmr.msra.gmra.mxu1 %vm840_vm0, %v2397_v41 }
 0x416   : > { %2421 = vmatpush3.xpose.msk.msra.mxu1 %vm840_vm0, %v3230_v12  ;;  %2424 = vmatprep.mubr.msk.f32.mxu1 %vm840_vm0, %v3232_v13 }
 0x417   : > { %2422 = vmatprep.subr.msk.mxu1 %vm840_vm0, %v1373_v25 }
 0x41a   : > { %2423 = vmatpush3.xpose.msk.msra.mxu1 %vm840_vm0, %v1373_v25 }
 0x41b   : > { %2427 = vmatprep.subr.mxu1 %v1466_v43 }
 0x41d   : > { %2425 = vmatmul.mubr.msk.f32.vlgmr.msra.gmra.mxu1 %vm840_vm0, %v1371_v26 }
 0x41e   : > { %2428 = vmatpush3.msra.mxu1 %v1466_v43 }
 0x41f   : > { %2429 = vmatprep.subr.mxu1 %v1464_v44 }
 0x420   : > { %2430 = vmatpush3.msra.mxu1 %v1464_v44 }
 0x421   : > { %2434 = vmatprep.subr.mxu1 %v1553_v45 }
 0x4d5   : > { %v2408_v46 = vpop.f32.mrf.mxu1 }
 0x4d6   : > { %v1365_v9 = vadd.f32 %v2419_v58, %v2408_v46 }
 0x4d7   : > { %v1278_v47 = vpop.f32.mrf.mxu1 }
 0x4d8   : > { %v1360_v11 = vadd.f32 %v1359_v59, %v1278_v47 }
 0x4dd   : > { %v2426_v48 = vpop.f32.mrf.mxu1 }
 0x4de   : > { %v1460_v49 = vmul.f32 0.17677669, %v2426_v48 }
 0x4df   : > { %v1450_v50 = vpop.f32.mrf.mxu1 }
 0x4e0   : > { %v1459_v51 = vmul.f32 0.17677669, %v1450_v50 }
 0x4e2   : > { %2582 = vtanh.f32 %v1459_v51 }
 0x4e3   : > { %2584 = vtanh.f32 %v1460_v49 }
 0x4e4   : > { %2586 = vtanh.f32 %v1728_v62 }
 0x4e5   : > { %2588 = vtanh.f32 %v1729_v63 }
 0x4ef   : > { %v2583_v52 = vpop.eup %2582 }
 0x4f0   : > { %v2585_v53 = vpop.eup %2584  ;;  %2431 = vmatprep.mubr.msk.f32.mxu1 %vm932_vm1, %v2583_v52 }
 0x4f1   : > { %2432 = vmatmul.mubr.msk.f32.vlgmr.msra.gmra.mxu1 %vm932_vm1, %v2585_v53  ;;  %v2587_v2 = vpop.eup %2586 }
 0x4f2   : > { %2435 = vmatpush3.msra.mxu1 %v1553_v45  ;;  %v2589_v4 = vpop.eup %2588 }
 0x4f3   : > { %2436 = vmatprep.subr.mxu1 %v1552_v54 }
 0x4f4   : > { %2437 = vmatpush3.msra.mxu1 %v1552_v54 }
 0x4f5   : > { %2438 = vmatprep.subr.mxu1 %v1551_v55 }
 0x4f6   : > { %2439 = vmatpush3.msra.mxu1 %v1551_v55 }
 0x4f7   : > { %2440 = vmatprep.subr.mxu1 %v1550_v56 }
 0x4f8   : > { %2441 = vmatpush3.msra.mxu1 %v1550_v56 }
 0x4f9   : > { %2452 = vmatprep.subr.mxu1 %v1735_v57 }
 0x5b1   : > { %v2433_v0 = vpop.f32.mrf.mxu1 }
 0x5b3   : > { %v1541_v1 = vpop.f32.mrf.mxu1 }
 0x5b4   : > { %2442 = vmatprep.mubr.msk.f32.mxu1 %vm840_vm0, %v1541_v1 }
 0x5b5   : > { %2443 = vmatmul.mubr.msk.f32.vlgmr.msra.gmra.mxu1 %vm840_vm0, %v2433_v0 }
 0x5b6   : > { %2453 = vmatpush3.msra.mxu1 %v1735_v57  ;;  %2456 = vmatprep.mubr.msk.f32.mxu1 %vm932_vm1, %v2587_v2 }
 0x5b7   : > { %2454 = vmatprep.subr.mxu1 %v1733_v3 }
 0x5b8   : > { %2455 = vmatpush3.msra.mxu1 %v1733_v3 }
 0x5b9   : > { %2457 = vmatmul.mubr.msk.f32.vlgmr.msra.gmra.mxu1 %vm932_vm1, %v2589_v4 }
 0x675   : > { %v2444_v10 = vpop.f32.mrf.mxu1 }
 0x676   : > { %v1636_v12 = vadd.f32 %v2444_v10, %v1365_v9 }
 0x677   : > { %v1626_v13 = vpop.f32.mrf.mxu1 }
 0x678   : > { %v1635_v14 = vadd.f32 %v1626_v13, %v1360_v11 }
 0x679   : > { %v2458_v15 = vpop.f32.mrf.mxu1 }
 0x67b   : > { %v1810_v16 = vpop.f32.mrf.mxu1 }
 0x67c   : > { %2467 = vmatprep.mubr.msk.f32.mxu0 %vm840_vm0, %v1810_v16 }
 0x67d   : > { %2468 = vmatmul.mubr.msk.f32.vlgmr.msra.gmra.mxu0 %vm840_vm0, %v2458_v15 }
 0x73d   : > { %v2469_v17 = vpop.f32.mrf.mxu0 }
 0x73e   : > { %v1905_v19 = vadd.f32 %v2469_v17, %v1636_v12 }
 0x73f   : > { %v1895_v20 = vpop.f32.mrf.mxu0 }
 0x740   : > { %v1914_v21 = vadd.f32 %v2145_v18, %v1905_v19  ;;  %v1904_v22 = vadd.f32 %v1895_v20, %v1635_v14 }
 0x742   : > { %1916 = vst [vmem:[%s539_s7 + $0x8] sm:$0xff] %v1914_v21  ;;  %v1913_v23 = vadd.f32 %v2145_v18, %v1904_v22 }
 0x744   : > { %1915 = vst [vmem:[%s539_s7] sm:$0xff] %v1913_v23 }
 0x745   : > { %2791 = shalt.err (!%p2788_p6)
}
 0x746   : > { %s2792_s26 = scalar_lea.hbm %s3280_s14, 256  ;;  %s2796_s30 = scalar_lea.hbm %s3389_s23, 512 }
 0x747   : > { %p2793_p13 = scmp.ne.s32.totalorder %s3280_s14, %s2792_s26  ;;  %p2797_p2 = scmp.lt.s32.totalorder %s3280_s14, %s3389_s23 }
 0x748   : > { %p2798_p0 = scmp.lt.s32.totalorder %s2796_s30, %s2792_s26 }
 0x749   : > { %p2794_p7 = pnand %p2793_p13, %p3390_p5 }
 0x74a   : > { %p2799_p1 = por %p2798_p0, %p2797_p2 }
 0x74b   : > { %p2795_p9 = pneg %p2794_p7 }
 0x74d   : > { %p2800_p12 = pnand %p2799_p1, %p2795_p9 }
 0x74f   : > { %2803 = shalt.err (!%p2800_p12)
}
 0x750   : > { %s2869_s7 = smov 128   ;;  %s2870_s24 = smov 8  }
 0x751   : > { %2492 = dma.vmem_to_hbm [thread:$0]  (%p3390_p5), %s3275_s15, 256, %s3280_s14, %s1918_s16, %s2869_s7, %s2869_s7, %s2870_s24  }
 0x752 PF: > { %s3391_s25 = sld [smem:[#allocation20_spill]] }
 0x753   : > { %s3392_s11 = sld [smem:[#allocation22_spill]] }
 0x754   : > { %s3393_s17 = sld [smem:[#allocation21_spill]] }
 0x758   : > { %s1946_s28 = sand.u32 1, %s3391_s25  }
 0x759   : > { %p3394_p4 = scmp.ne.s32.totalorder %s3392_s11, 0  ;;  %s1947_s21 = scalar_lea.sflag [#allocation4], %s1946_s28 }
 0x75a   : > { %p3395_p8 = scmp.ge.s32.totalorder %s3393_s17, 2 }
 0x75c   : > { %p2518_p11 = pnand %p3395_p8, %p3394_p4 }
 0x75e   : > { %p2519_p10 = pneg %p2518_p11 }
 0x760   : > { %2837 = dma.done.wait (%p2519_p10), %s1947_s21, 256  }
 0x761   : > { %2839 = vsyncadd (%p2519_p10), %s1947_s21, 4294967040  ;;  %s3396_s20 = sld [smem:[#allocation23_spill]]  ;;  %s3398_s17 = smov %s2846_s18 }
 0x762   : > { %s3397_s12 = sld [smem:[#allocation25_spill]]  ;;  %s3399_s18 = smov %s2850_s19 }
 0x767   : > { %p29_p3 = scmp.ge.s32.totalorder %s3396_s20, 4  }
 0x768   : > { %s3400_s19 = smov %s3397_s12 }
 0x769   :  { %31 = sbr.rel (!%p29_p3) target bundleno = 14 (0xe), region = 149 }
 0x76e   :  { %1952 = vsyncpa [#allocation3], 1 }
 0x76f   :  { %1954 = vsyncpa [#allocation3 + $0x1], 1 }
 0x770   :  { %1955 = vsyncpa [#allocation6], 1 }
 0x771   :  { %1957 = vsyncpa [#allocation6 + $0x1], 1 }
 0x772   :  { %1958 = vsyncpa [#allocation9], 1 }
 0x773   :  { %1959 = vsyncpa [#allocation12], 1 }
 0x774   :  { %1960 = vsyncpa [#allocation4], 1 }
 0x775   :  { %1962 = vsyncpa [#allocation4 + $0x1], 1 }

</bundles_post_ra>
